<compile_context>
chip_gen: v7x
topology: tpu7x:2x2x1
jax: 0.10.0
libtpu: 0.0.40
codegen_flags: <defaults>
</compile_context>

<pallas_src>
import numpy as np
import jax
import jax.numpy as jnp
from jax import lax
from jax.experimental import pallas as pl
from jax.experimental.pallas import tpu as pltpu

# ---- sizes consistent with the module's forward (4x4 spatial is required) ---
B = 2                       # batch
C_DIM = 32                  # c_dim (mapping-network embed_dim)
CHANNEL_BASE = 4
NUM_ATTR = 312              # MappingNetwork(312, ...)
NUM_LAYERS = 8
H = W = 4                   # conv2 is 4x4/valid -> spatial must be 4x4
CB8 = CHANNEL_BASE * 8      # x channels
COUT1 = CHANNEL_BASE * 2    # conv1 out channels
CIN = CB8 + C_DIM           # conv1 in channels (cat of x and tiled y)
SLAB = H * W * COUT1        # 128: conv1 activations per sample (lane-dense)


def _vmem():
    return pl.BlockSpec(memory_space=pltpu.MemorySpace.VMEM)


# ------------------------------ fused kernel ---------------------------------
def cond_epilogue_kernel(y_ref, xf_ref, we_ref, wf_ref, wx_ref, wy_ref,
                         w2_ref, out_ref):
    # MappingNetwork with the linear (zero-bias) embed folded into fc0:
    # 9 serially-dependent matmuls instead of 10.
    h = jnp.dot(y_ref[...], we_ref[...], preferred_element_type=jnp.float32)
    h = jnp.maximum(h, 0.2 * h)                        # fc0 leaky_relu(., 0.2)
    for i in range(NUM_LAYERS - 1):                    # fc1..fc7 (unrolled)
        h = jnp.dot(h, wf_ref[i], preferred_element_type=jnp.float32)
        h = jnp.maximum(h, 0.2 * h)
    # conv1 (3x3, pad 1, bias=False) on cat([x, tile(y_emb)], C), folded into
    # two dense matmuls producing a lane-dense (B, H*W*COUT1) slab.
    # xf/wx are bf16 operands; accumulation is f32.
    c1 = (jnp.dot(xf_ref[...], wx_ref[...], preferred_element_type=jnp.float32)
          + jnp.dot(h, wy_ref[...], preferred_element_type=jnp.float32))
    c1 = jnp.maximum(c1, 0.2 * c1)                     # LeakyReLU(0.2)
    # conv2 (4x4, valid, bias=False) + flatten == per-sample contraction,
    # done on the VPU (mul) + XLU (lane reduce) instead of a 1-column matmul.
    out_ref[...] = jnp.sum(c1 * w2_ref[...], axis=-1, keepdims=True)


def _cost_estimate(batch):
    flops = 2 * batch * (NUM_ATTR * C_DIM
                         + (NUM_LAYERS - 1) * C_DIM * C_DIM
                         + CB8 * H * W * SLAB
                         + C_DIM * SLAB
                         + SLAB)
    bytes_accessed = (batch * NUM_ATTR * 4          # y (f32)
                      + batch * CB8 * H * W * 2     # x_flat (bf16)
                      + NUM_ATTR * C_DIM * 4        # we_eff
                      + (NUM_LAYERS - 1) * C_DIM * C_DIM * 4  # wf_rest
                      + CB8 * H * W * SLAB * 2      # wx (bf16)
                      + C_DIM * SLAB * 4            # wy
                      + SLAB * 4                    # w2v
                      + batch * 4)                  # out
    return pl.CostEstimate(flops=flops, transcendentals=0,
                           bytes_accessed=bytes_accessed)


def cond_epilogue_call(y, x_flat, we_eff, wf_rest, wx, wy, w2v):
    return pl.pallas_call(
        cond_epilogue_kernel,
        out_shape=jax.ShapeDtypeStruct((y.shape[0], 1), jnp.float32),
        in_specs=[_vmem()] * 7,
        out_specs=_vmem(),
        cost_estimate=_cost_estimate(y.shape[0]),
    )(y, x_flat, we_eff, wf_rest, wx, wy, w2v)


# --------------------- parameter-derived constants (init-time) ---------------
def _fold_conv_weights(w1, w2):
    """Fold the two convs into dense matmul operands (done once at init).

    Orderings:
      x_flat column index : i = cin*(H*W) + hi*W + wi   (plain NCHW reshape)
      conv1 slab column   : j = (h*W + w)*COUT1 + c
    """
    w1 = np.asarray(w1, np.float32)                    # (COUT1, CIN, 3, 3)
    w2 = np.asarray(w2, np.float32)                    # (1, COUT1, H, W)
    wx = np.zeros((CB8 * H * W, SLAB), np.float32)
    wy = np.zeros((C_DIM, SLAB), np.float32)
    cin_rows = np.arange(CB8) * (H * W)
    for oh in range(H):
        for ow in range(W):
            cols = (oh * W + ow) * COUT1 + np.arange(COUT1)
            for kh in range(3):
                for kw in range(3):
                    hi, wi = oh + kh - 1, ow + kw - 1
                    if not (0 <= hi < H and 0 <= wi < W):
                        continue                        # pad-1 zero padding
                    wx[np.ix_(cin_rows + hi * W + wi, cols)] += w1[:, :CB8, kh, kw].T
                    # y_emb is tiled to every spatial position -> sum taps.
                    wy[:, cols] += w1[:, CB8:, kh, kw].T
    # (h, w, c) order == slab column order j; row-vector for VPU mul + reduce.
    w2v = np.transpose(w2[0], (1, 2, 0)).reshape(1, SLAB)
    return jnp.asarray(wx), jnp.asarray(wy), jnp.asarray(w2v)


def init_params(key):
    k = jax.random.split(key, 4)
    # MappingNetwork.embed = FullyConnectedLayer(312, c_dim, linear, lr_mult=1)
    we_raw = jax.random.normal(k[0], (C_DIM, NUM_ATTR), jnp.float32)       # randn / 1
    we = (we_raw * (1.0 / np.sqrt(NUM_ATTR))).T                            # (312, c_dim)
    # fc0..fc7 = FullyConnectedLayer(c_dim, c_dim, lrelu, lr_mult=0.01)
    wf_raw = jax.random.normal(k[1], (NUM_LAYERS, C_DIM, C_DIM), jnp.float32) / 0.01
    wf = jnp.transpose(wf_raw * (0.01 / np.sqrt(C_DIM)), (0, 2, 1))        # (8, in, out)
    # Biases: bias_init=0 everywhere -> identically zero -> folded away.
    # conv weights (OIHW), bias=False
    w1 = jax.random.normal(k[2], (COUT1, CIN, 3, 3), jnp.float32) / np.sqrt(CIN * 9)
    w2 = jax.random.normal(k[3], (1, COUT1, 4, 4), jnp.float32) / np.sqrt(COUT1 * 16)
    wx, wy, w2v = _fold_conv_weights(w1, w2)
    # Fold the linear, zero-bias embed into fc0 (exact): 312x32 @ 32x32.
    we_eff = jnp.dot(we, wf[0], precision=lax.Precision.HIGHEST)           # (312, 32)
    wf_rest = wf[1:]                                                       # (7, 32, 32)
    return dict(we=we, wf=wf, w1=w1, w2=w2,                 # original-form (reference)
                we_eff=we_eff, wf_rest=wf_rest,             # fused kernel operands
                wx=wx.astype(jnp.bfloat16),                 # dominant DMA: bf16
                wy=wy, w2v=w2v)


# ---------------------------------- forward -----------------------------------
@jax.jit
def cond_epilogue_forward(x, y, params):
    # Only per-call glue: a layout-preserving NCHW flatten + bf16 cast.
    x_flat = x.reshape(x.shape[0], CB8 * H * W).astype(jnp.bfloat16)
    return cond_epilogue_call(y, x_flat, params['we_eff'], params['wf_rest'],
                              params['wx'], params['wy'], params['w2v'])


# ---------------------------- pure-JAX reference -------------------------------
def reference(x, y, params):
    h = jnp.dot(y, params['we'], precision=lax.Precision.HIGHEST)
    for i in range(NUM_LAYERS):
        h = jnp.dot(h, params['wf'][i], precision=lax.Precision.HIGHEST)
        h = jnp.where(h >= 0, h, 0.2 * h)
    y_t = jnp.broadcast_to(h[:, :, None, None], (x.shape[0], C_DIM, H, W))
    inp = jnp.concatenate([x, y_t], axis=1)
    c1 = lax.conv_general_dilated(inp, params['w1'], (1, 1), 'SAME',
                                  dimension_numbers=('NCHW', 'OIHW', 'NCHW'),
                                  precision=lax.Precision.HIGHEST)
    c1 = jnp.where(c1 >= 0, c1, 0.2 * c1)
    c2 = lax.conv_general_dilated(c1, params['w2'], (1, 1), 'VALID',
                                  dimension_numbers=('NCHW', 'OIHW', 'NCHW'),
                                  precision=lax.Precision.HIGHEST)
    return c2.reshape(x.shape[0], -1)


if __name__ == "__main__":
    key = jax.random.PRNGKey(0)
    kx, ky, kp = jax.random.split(key, 3)
    x = jax.random.normal(kx, (B, CB8, H, W), jnp.float32)   # NCHW, like the module
    y = jax.random.normal(ky, (B, NUM_ATTR), jnp.float32)    # attribute vector (B, 312)
    params = init_params(kp)

    out = jax.block_until_ready(cond_epilogue_forward(x, y, params))

    ref = reference(x, y, params)
    # Tolerance widened slightly vs the all-f32 version to cover the bf16
    # storage of wx / x_flat (accumulation remains f32).
    np.testing.assert_allclose(np.asarray(out), np.asarray(ref), rtol=2e-2, atol=2e-2)
    assert out.shape == (B, 1)
    print("KERNEL_OK")
</pallas_src>

<mosaic_0001>
module attributes {stable_mosaic.version = 11 : i64} {
  func.func @cond_epilogue_kernel(%arg0: memref<2x312xf32, #tpu.memory_space<vmem>>, %arg1: memref<2x512xbf16, #tpu.memory_space<vmem>>, %arg2: memref<312x32xf32, #tpu.memory_space<vmem>>, %arg3: memref<7x32x32xf32, #tpu.memory_space<vmem>>, %arg4: memref<512x128xbf16, #tpu.memory_space<vmem>>, %arg5: memref<32x128xf32, #tpu.memory_space<vmem>>, %arg6: memref<1x128xf32, #tpu.memory_space<vmem>>, %arg7: memref<2x1xf32, #tpu.memory_space<vmem>>) attributes {dimension_semantics = [], scalar_prefetch = 0 : i64, scratch_operands = 0 : i64, tpu.core_type = #tpu.core_type<tc>} {
    %c0 = arith.constant 0 : index
    %c0_0 = arith.constant 0 : index
    %0 = vector.load %arg0[%c0, %c0_0] : memref<2x312xf32, #tpu.memory_space<vmem>>, vector<2x312xf32>
    %c0_1 = arith.constant 0 : index
    %c0_2 = arith.constant 0 : index
    %1 = vector.load %arg2[%c0_1, %c0_2] : memref<312x32xf32, #tpu.memory_space<vmem>>, vector<312x32xf32>
    %cst = arith.constant dense<0.000000e+00> : vector<2x32xf32>
    %2 = tpu.matmul %0, %1, %cst {dimension_numbers = #tpu.dot_dimension_numbers<[1], [0], [0], [1], [0, 0, 1, 1], [], []>} : vector<2x312xf32>, vector<312x32xf32>, vector<2x32xf32> -> vector<2x32xf32>
    %cst_3 = arith.constant 2.000000e-01 : f32
    %3 = vector.broadcast %cst_3 : f32 to vector<2x32xf32>
    %4 = arith.mulf %3, %2 : vector<2x32xf32>
    %5 = arith.maximumf %2, %4 : vector<2x32xf32>
    %c0_4 = arith.constant 0 : index
    %c0_5 = arith.constant 0 : index
    %c0_6 = arith.constant 0 : index
    %6 = vector.load %arg3[%c0_4, %c0_5, %c0_6] : memref<7x32x32xf32, #tpu.memory_space<vmem>>, vector<1x32x32xf32>
    %7 = vector.shape_cast %6 : vector<1x32x32xf32> to vector<32x32xf32>
    %cst_7 = arith.constant dense<0.000000e+00> : vector<2x32xf32>
    %8 = tpu.matmul %5, %7, %cst_7 {dimension_numbers = #tpu.dot_dimension_numbers<[1], [0], [0], [1], [0, 0, 1, 1], [], []>} : vector<2x32xf32>, vector<32x32xf32>, vector<2x32xf32> -> vector<2x32xf32>
    %cst_8 = arith.constant 2.000000e-01 : f32
    %9 = vector.broadcast %cst_8 : f32 to vector<2x32xf32>
    %10 = arith.mulf %9, %8 : vector<2x32xf32>
    %11 = arith.maximumf %8, %10 : vector<2x32xf32>
    %c1 = arith.constant 1 : index
    %c0_9 = arith.constant 0 : index
    %c0_10 = arith.constant 0 : index
    %12 = vector.load %arg3[%c1, %c0_9, %c0_10] : memref<7x32x32xf32, #tpu.memory_space<vmem>>, vector<1x32x32xf32>
    %13 = vector.shape_cast %12 : vector<1x32x32xf32> to vector<32x32xf32>
    %cst_11 = arith.constant dense<0.000000e+00> : vector<2x32xf32>
    %14 = tpu.matmul %11, %13, %cst_11 {dimension_numbers = #tpu.dot_dimension_numbers<[1], [0], [0], [1], [0, 0, 1, 1], [], []>} : vector<2x32xf32>, vector<32x32xf32>, vector<2x32xf32> -> vector<2x32xf32>
    %cst_12 = arith.constant 2.000000e-01 : f32
    %15 = vector.broadcast %cst_12 : f32 to vector<2x32xf32>
    %16 = arith.mulf %15, %14 : vector<2x32xf32>
    %17 = arith.maximumf %14, %16 : vector<2x32xf32>
    %c2 = arith.constant 2 : index
    %c0_13 = arith.constant 0 : index
    %c0_14 = arith.constant 0 : index
    %18 = vector.load %arg3[%c2, %c0_13, %c0_14] : memref<7x32x32xf32, #tpu.memory_space<vmem>>, vector<1x32x32xf32>
    %19 = vector.shape_cast %18 : vector<1x32x32xf32> to vector<32x32xf32>
    %cst_15 = arith.constant dense<0.000000e+00> : vector<2x32xf32>
    %20 = tpu.matmul %17, %19, %cst_15 {dimension_numbers = #tpu.dot_dimension_numbers<[1], [0], [0], [1], [0, 0, 1, 1], [], []>} : vector<2x32xf32>, vector<32x32xf32>, vector<2x32xf32> -> vector<2x32xf32>
    %cst_16 = arith.constant 2.000000e-01 : f32
    %21 = vector.broadcast %cst_16 : f32 to vector<2x32xf32>
    %22 = arith.mulf %21, %20 : vector<2x32xf32>
    %23 = arith.maximumf %20, %22 : vector<2x32xf32>
    %c3 = arith.constant 3 : index
    %c0_17 = arith.constant 0 : index
    %c0_18 = arith.constant 0 : index
    %24 = vector.load %arg3[%c3, %c0_17, %c0_18] : memref<7x32x32xf32, #tpu.memory_space<vmem>>, vector<1x32x32xf32>
    %25 = vector.shape_cast %24 : vector<1x32x32xf32> to vector<32x32xf32>
    %cst_19 = arith.constant dense<0.000000e+00> : vector<2x32xf32>
    %26 = tpu.matmul %23, %25, %cst_19 {dimension_numbers = #tpu.dot_dimension_numbers<[1], [0], [0], [1], [0, 0, 1, 1], [], []>} : vector<2x32xf32>, vector<32x32xf32>, vector<2x32xf32> -> vector<2x32xf32>
    %cst_20 = arith.constant 2.000000e-01 : f32
    %27 = vector.broadcast %cst_20 : f32 to vector<2x32xf32>
    %28 = arith.mulf %27, %26 : vector<2x32xf32>
    %29 = arith.maximumf %26, %28 : vector<2x32xf32>
    %c4 = arith.constant 4 : index
    %c0_21 = arith.constant 0 : index
    %c0_22 = arith.constant 0 : index
    %30 = vector.load %arg3[%c4, %c0_21, %c0_22] : memref<7x32x32xf32, #tpu.memory_space<vmem>>, vector<1x32x32xf32>
    %31 = vector.shape_cast %30 : vector<1x32x32xf32> to vector<32x32xf32>
    %cst_23 = arith.constant dense<0.000000e+00> : vector<2x32xf32>
    %32 = tpu.matmul %29, %31, %cst_23 {dimension_numbers = #tpu.dot_dimension_numbers<[1], [0], [0], [1], [0, 0, 1, 1], [], []>} : vector<2x32xf32>, vector<32x32xf32>, vector<2x32xf32> -> vector<2x32xf32>
    %cst_24 = arith.constant 2.000000e-01 : f32
    %33 = vector.broadcast %cst_24 : f32 to vector<2x32xf32>
    %34 = arith.mulf %33, %32 : vector<2x32xf32>
    %35 = arith.maximumf %32, %34 : vector<2x32xf32>
    %c5 = arith.constant 5 : index
    %c0_25 = arith.constant 0 : index
    %c0_26 = arith.constant 0 : index
    %36 = vector.load %arg3[%c5, %c0_25, %c0_26] : memref<7x32x32xf32, #tpu.memory_space<vmem>>, vector<1x32x32xf32>
    %37 = vector.shape_cast %36 : vector<1x32x32xf32> to vector<32x32xf32>
    %cst_27 = arith.constant dense<0.000000e+00> : vector<2x32xf32>
    %38 = tpu.matmul %35, %37, %cst_27 {dimension_numbers = #tpu.dot_dimension_numbers<[1], [0], [0], [1], [0, 0, 1, 1], [], []>} : vector<2x32xf32>, vector<32x32xf32>, vector<2x32xf32> -> vector<2x32xf32>
    %cst_28 = arith.constant 2.000000e-01 : f32
    %39 = vector.broadcast %cst_28 : f32 to vector<2x32xf32>
    %40 = arith.mulf %39, %38 : vector<2x32xf32>
    %41 = arith.maximumf %38, %40 : vector<2x32xf32>
    %c6 = arith.constant 6 : index
    %c0_29 = arith.constant 0 : index
    %c0_30 = arith.constant 0 : index
    %42 = vector.load %arg3[%c6, %c0_29, %c0_30] : memref<7x32x32xf32, #tpu.memory_space<vmem>>, vector<1x32x32xf32>
    %43 = vector.shape_cast %42 : vector<1x32x32xf32> to vector<32x32xf32>
    %cst_31 = arith.constant dense<0.000000e+00> : vector<2x32xf32>
    %44 = tpu.matmul %41, %43, %cst_31 {dimension_numbers = #tpu.dot_dimension_numbers<[1], [0], [0], [1], [0, 0, 1, 1], [], []>} : vector<2x32xf32>, vector<32x32xf32>, vector<2x32xf32> -> vector<2x32xf32>
    %cst_32 = arith.constant 2.000000e-01 : f32
    %45 = vector.broadcast %cst_32 : f32 to vector<2x32xf32>
    %46 = arith.mulf %45, %44 : vector<2x32xf32>
    %47 = arith.maximumf %44, %46 : vector<2x32xf32>
    %c0_33 = arith.constant 0 : index
    %c0_34 = arith.constant 0 : index
    %48 = vector.load %arg1[%c0_33, %c0_34] : memref<2x512xbf16, #tpu.memory_space<vmem>>, vector<2x512xbf16>
    %c0_35 = arith.constant 0 : index
    %c0_36 = arith.constant 0 : index
    %49 = vector.load %arg4[%c0_35, %c0_36] : memref<512x128xbf16, #tpu.memory_space<vmem>>, vector<512x128xbf16>
    %cst_37 = arith.constant dense<0.000000e+00> : vector<2x128xf32>
    %50 = tpu.matmul %48, %49, %cst_37 {dimension_numbers = #tpu.dot_dimension_numbers<[1], [0], [0], [1], [0, 0, 1, 1], [], []>} : vector<2x512xbf16>, vector<512x128xbf16>, vector<2x128xf32> -> vector<2x128xf32>
    %c0_38 = arith.constant 0 : index
    %c0_39 = arith.constant 0 : index
    %51 = vector.load %arg5[%c0_38, %c0_39] : memref<32x128xf32, #tpu.memory_space<vmem>>, vector<32x128xf32>
    %cst_40 = arith.constant dense<0.000000e+00> : vector<2x128xf32>
    %52 = tpu.matmul %47, %51, %cst_40 {dimension_numbers = #tpu.dot_dimension_numbers<[1], [0], [0], [1], [0, 0, 1, 1], [], []>} : vector<2x32xf32>, vector<32x128xf32>, vector<2x128xf32> -> vector<2x128xf32>
    %53 = arith.addf %50, %52 : vector<2x128xf32>
    %cst_41 = arith.constant 2.000000e-01 : f32
    %54 = vector.broadcast %cst_41 : f32 to vector<2x128xf32>
    %55 = arith.mulf %54, %53 : vector<2x128xf32>
    %56 = arith.maximumf %53, %55 : vector<2x128xf32>
    %c0_42 = arith.constant 0 : index
    %c0_43 = arith.constant 0 : index
    %57 = vector.load %arg6[%c0_42, %c0_43] : memref<1x128xf32, #tpu.memory_space<vmem>>, vector<1x128xf32>
    %58 = vector.broadcast %57 : vector<1x128xf32> to vector<2x128xf32>
    %59 = arith.mulf %56, %58 : vector<2x128xf32>
    %cst_44 = arith.constant dense<0.000000e+00> : vector<2xf32>
    %60 = vector.multi_reduction <add>, %59, %cst_44 [1] : vector<2x128xf32> to vector<2xf32>
    %61 = vector.shape_cast %60 : vector<2xf32> to vector<2x1xf32>
    %c0_45 = arith.constant 0 : index
    %c0_46 = arith.constant 0 : index
    %62 = vector.load %arg7[%c0_45, %c0_46] : memref<2x1xf32, #tpu.memory_space<vmem>>, vector<2x1xf32>
    tpu.vector_store %arg7[%c0_45, %c0_46], %61 {strides = array<i32>} : memref<2x1xf32, #tpu.memory_space<vmem>>, vector<2x1xf32>,
    return
  }
}

</mosaic_0001>

<bundles_post_ra>
// kernel: cond_epilogue_forward.1
= control target key start
LH: loop header
LB: loop body
LE: loop exit
PB: predicated region body
PF: predicated region fallthrough
CT: control target
= control target key end

     0   :  { %v1680_v3 = vmov 0.0|0.0   ;;  %v1681_v8 = vmov 1983009808   ;;  %v72_v10 = vlaneseq  ;;  %vm1682_vm0 = vmmov 0   ;;  %s2096_s2 = inlined_call_operand.vmem [shape: f32[312,32], index: 2, kind: input, shape index: {}]   ;;  %s2097_s0 = inlined_call_operand.vmem [shape: f32[2,312], index: 0, kind: input, shape index: {}]   ;;  %s2098_s3 = inlined_call_operand.vmem [shape: f32[7,32,32], index: 3, kind: input, shape index: {}]   ;;  %s2099_s4 = inlined_call_operand.vmem [shape: bf16[512,128], index: 4, kind: input, shape index: {}]   ;;  %s2100_s5 = inlined_call_operand.vmem [shape: f32[32,128], index: 5, kind: input, shape index: {}]   ;;  %s2101_s1 = inlined_call_operand.vmem [shape: bf16[2,512], index: 1, kind: input, shape index: {}]   ;;  %s2102_s6 = inlined_call_operand.vmem [shape: f32[1,128], index: 6, kind: input, shape index: {}]   ;;  %s2103_s7 = inlined_call_operand.vmem [shape: f32[2,1], index: 7, kind: output, shape index: {}]  }
   0x1   :  { %v44_v0 = vld [vmem:[%s2096_s2 + $0x80] sm:$0xff]  ;;  %v45_v1 = vld [vmem:[%s2096_s2 + $0x88] sm:$0xff]  ;;  %1585 = vmatprep.subr.bf16.mxu1 %v1680_v3  ;;  %v46_v6 = vld [vmem:[%s2096_s2 + $0x90] sm:$0xff]  ;;  %v70_v9 = vunpack.c.l.s4 %v1681_v8  ;;  %v1683_v11 = vmov 0.0   ;;  %vm86_vm1 = vcmask 457728   ;;  %vm235_vm2 = vcmask 261120  }
   0x2   :  { %v28_v2 = vld [vmem:[%s2096_s2] sm:$0xff]  ;;  %v1553_v4 = vpack.c.bf16 %v45_v1, %v44_v0  ;;  %v29_v5 = vld [vmem:[%s2096_s2 + $0x8] sm:$0xff]  ;;  %v47_v7 = vld [vmem:[%s2096_s2 + $0x98] sm:$0xff]  ;;  %1462 = vmatprep.mubr.msk.f32.mxu1 %vm1682_vm0, %v1683_v11  ;;  %v1764_v23 = vshrl.u32 %v72_v10, 7  ;;  %vm1244_vm3 = vcmask 1041408   ;;  %vm1248_vm4 = vcmask 1024  }
   0x3   :  { %v1555_v12 = vpack.c.bf16 %v29_v5, %v28_v2  ;;  %v1557_v13 = vpack.c.bf16 %v47_v7, %v46_v6  ;;  %v30_v14 = vld [vmem:[%s2096_s2 + $0x10] sm:$0xff]  ;;  %v31_v15 = vld [vmem:[%s2096_s2 + $0x18] sm:$0xff]  ;;  %v48_v16 = vld [vmem:[%s2096_s2 + $0xa0] sm:$0xff]  ;;  %v71_v22 = vunpack.c.0.s8 %v70_v9 }
   0x4   :  { %1554 = vmatprep.subr.bf16.mxu0 %v1553_v4  ;;  %v49_v17 = vld [vmem:[%s2096_s2 + $0xa8] sm:$0xff]  ;;  %v1559_v18 = vpack.c.bf16 %v31_v15, %v30_v14  ;;  %v32_v20 = vld [vmem:[%s2096_s2 + $0x20] sm:$0xff]  ;;  %v50_v24 = vld [vmem:[%s2096_s2 + $0xb0] sm:$0xff] }
   0x5   :  { %1556 = vmatpush3.bf16.msra.mxu0 %v1555_v12  ;;  %v1561_v19 = vpack.c.bf16 %v49_v17, %v48_v16  ;;  %v33_v21 = vld [vmem:[%s2096_s2 + $0x28] sm:$0xff]  ;;  %v51_v25 = vld [vmem:[%s2096_s2 + $0xb8] sm:$0xff]  ;;  %v60_v27 = vld [vmem:[%s2096_s2 + $0x100] sm:$0xff]  ;;  %v74_v34 = vsub.s32 %v71_v22, %v1764_v23 }
   0x6   :  { %1558 = vmatprep.subr.bf16.mxu0 %v1557_v13  ;;  %v1563_v26 = vpack.c.bf16 %v33_v21, %v32_v20  ;;  %v61_v28 = vld [vmem:[%s2096_s2 + $0x108] sm:$0xff]  ;;  %v1565_v29 = vpack.c.bf16 %v51_v25, %v50_v24  ;;  %v34_v30 = vld [vmem:[%s2096_s2 + $0x30] sm:$0xff]  ;;  %v35_v31 = vld [vmem:[%s2096_s2 + $0x38] sm:$0xff] }
   0x7   :  { %v52_v32 = vld [vmem:[%s2096_s2 + $0xc0] sm:$0xff]  ;;  %v1586_v33 = vpack.c.bf16 %v61_v28, %v60_v27  ;;  %v53_v35 = vld [vmem:[%s2096_s2 + $0xc8] sm:$0xff]  ;;  %v62_v36 = vld [vmem:[%s2096_s2 + $0x110] sm:$0xff]  ;;  %v1567_v39 = vpack.c.bf16 %v35_v31, %v34_v30 }
   0x8   :  { %v63_v37 = vld [vmem:[%s2096_s2 + $0x118] sm:$0xff]  ;;  %v64_v40 = vld [vmem:[%s2096_s2 + $0x120] sm:$0xff]  ;;  %v65_v41 = vld [vmem:[%s2096_s2 + $0x128] sm:$0xff]  ;;  %v1569_v43 = vpack.c.bf16 %v53_v35, %v52_v32 }
   0x9   :  { %1560 = vmatpush3.bf16.msra.mxu0 %v1559_v18  ;;  %1587 = vmatpush3.bf16.msra.mxu1 %v1586_v33  ;;  %v1589_v38 = vpack.c.bf16 %v63_v37, %v62_v36  ;;  %v27_v42 = vld [vmem:[%s2097_s0] sm:$0x3f]  ;;  %v37_v45 = vld [vmem:[%s2096_s2 + $0x48] sm:$0xff]  ;;  %v54_v47 = vld [vmem:[%s2096_s2 + $0xd0] sm:$0xff]  ;;  %v1592_v49 = vpack.c.bf16 %v65_v41, %v64_v40 }
   0xa   :  { %1562 = vmatprep.subr.bf16.mxu0 %v1561_v19  ;;  %1588 = vmatprep.subr.bf16.mxu1 %v1680_v3  ;;  %v36_v44 = vld [vmem:[%s2096_s2 + $0x40] sm:$0xff]  ;;  %v75_v46 = vrot.slane %v27_v42, %v74_v34  ;;  %v55_v48 = vld [vmem:[%s2096_s2 + $0xd8] sm:$0xff]  ;;  %v68_v52 = vcombine.high %v27_v42, %v27_v42  ;;  %v38_v54 = vld [vmem:[%s2096_s2 + $0x50] sm:$0xff] }
   0xb   :  { %v1571_v51 = vpack.c.bf16 %v37_v45, %v36_v44  ;;  %v1573_v53 = vpack.c.bf16 %v55_v48, %v54_v47  ;;  %v39_v55 = vld [vmem:[%s2096_s2 + $0x58] sm:$0xff]  ;;  %v56_v56 = vld [vmem:[%s2096_s2 + $0xe0] sm:$0xff]  ;;  %v57_v57 = vld [vmem:[%s2096_s2 + $0xe8] sm:$0xff] }
   0xc   :  { %v83_v50 = vcombine.high %v75_v46, %v75_v46  ;;  %v1575_v58 = vpack.c.bf16 %v39_v55, %v38_v54  ;;  %v82_v59 = vrot.slane %v68_v52, %v74_v34  ;;  %v66_v60 = vld [vmem:[%s2096_s2 + $0x130] sm:$0xff]  ;;  %v1577_v61 = vpack.c.bf16 %v57_v57, %v56_v56  ;;  %v40_v62 = vld [vmem:[%s2096_s2 + $0x60] sm:$0xff]  ;;  %v41_v63 = vld [vmem:[%s2096_s2 + $0x68] sm:$0xff] }
   0xd   :  { %1564 = vmatpush3.bf16.msra.mxu0 %v1563_v26  ;;  %1590 = vmatpush3.bf16.msra.mxu1 %v1589_v38  ;;  %v58_v0 = vld [vmem:[%s2096_s2 + $0xf0] sm:$0xff]  ;;  %v59_v1 = vld [vmem:[%s2096_s2 + $0xf8] sm:$0xff]  ;;  %v1579_v2 = vpack.c.bf16 %v41_v63, %v40_v62  ;;  %v231_v8 = vld [vmem:[%s2098_s3] sm:$0xff] }
   0xe   :  { %1566 = vmatprep.subr.bf16.mxu0 %v1565_v29  ;;  %1591 = vmatprep.subr.bf16.mxu1 %v1680_v3  ;;  %v1581_v4 = vpack.c.bf16 %v59_v1, %v58_v0  ;;  %v42_v5 = vld [vmem:[%s2096_s2 + $0x70] sm:$0xff]  ;;  %v43_v6 = vld [vmem:[%s2096_s2 + $0x78] sm:$0xff]  ;;  %v232_v9 = vld [vmem:[%s2098_s3 + $0x8] sm:$0xff] }
   0xf   :  { %153 = vmatprep.mubr.f32.mxu0 %v83_v50  ;;  %v1583_v7 = vpack.c.bf16 %v43_v6, %v42_v5  ;;  %v1595_v10 = vpack.c.bf16 %v232_v9, %v231_v8  ;;  %v233_v12 = vld [vmem:[%s2098_s3 + $0x10] sm:$0xff]  ;;  %v234_v13 = vld [vmem:[%s2098_s3 + $0x18] sm:$0xff]  ;;  %v1256_v21 = vld [vmem:[%s2098_s3 + $0x20] sm:$0xff] }
  0x10   :  { %v1598_v14 = vpack.c.bf16 %v234_v13, %v233_v12  ;;  %v1257_v22 = vld [vmem:[%s2098_s3 + $0x28] sm:$0xff]  ;;  %v1258_v27 = vld [vmem:[%s2098_s3 + $0x30] sm:$0xff]  ;;  %v1259_v28 = vld [vmem:[%s2098_s3 + $0x38] sm:$0xff] }
  0x11   :  { %1568 = vmatpush3.bf16.msra.mxu0 %v1567_v39  ;;  %1593 = vmatpush3.bf16.msra.mxu1 %v1592_v49  ;;  %v1601_v25 = vpack.c.bf16 %v1257_v22, %v1256_v21  ;;  %v1604_v29 = vpack.c.bf16 %v1259_v28, %v1258_v27  ;;  %v1261_v30 = vld [vmem:[%s2098_s3 + $0x40] sm:$0xff]  ;;  %v1262_v31 = vld [vmem:[%s2098_s3 + $0x48] sm:$0xff]  ;;  %v1263_v37 = vld [vmem:[%s2098_s3 + $0x50] sm:$0xff] }
  0x12   :  { %1570 = vmatprep.subr.bf16.mxu0 %v1569_v43  ;;  %1460 = vmatprep.subr.mxu1 %v1683_v11  ;;  %v1607_v35 = vpack.c.bf16 %v1262_v31, %v1261_v30  ;;  %v1264_v38 = vld [vmem:[%s2098_s3 + $0x58] sm:$0xff]  ;;  %v1266_v40 = vld [vmem:[%s2098_s3 + $0x60] sm:$0xff]  ;;  %v1267_v41 = vld [vmem:[%s2098_s3 + $0x68] sm:$0xff] }
  0x13   :  { %v1610_v39 = vpack.c.bf16 %v1264_v38, %v1263_v37  ;;  %v1613_v42 = vpack.c.bf16 %v1267_v41, %v1266_v40  ;;  %v1268_v47 = vld [vmem:[%s2098_s3 + $0x70] sm:$0xff]  ;;  %v1269_v48 = vld [vmem:[%s2098_s3 + $0x78] sm:$0xff]  ;;  %v1271_v50 = vld [vmem:[%s2098_s3 + $0x80] sm:$0xff]  ;;  %v1684_v40 = vmov 1966171168  }
  0x14   :  { %v1616_v49 = vpack.c.bf16 %v1269_v48, %v1268_v47  ;;  %v1273_v57 = vld [vmem:[%s2098_s3 + $0x90] sm:$0xff]  ;;  %v1279_v5 = vld [vmem:[%s2098_s3 + $0xb8] sm:$0xff]  ;;  %v1282_v8 = vld [vmem:[%s2098_s3 + $0xc8] sm:$0xff]  ;;  %v943_v41 = vunpack.c.l.s4 %v1684_v40 }
  0x15   :  { %1572 = vmatpush3.bf16.msra.mxu0 %v1571_v51  ;;  %1461 = vmatpush3.msra.mxu1 %v66_v60  ;;  %v1272_v51 = vld [vmem:[%s2098_s3 + $0x88] sm:$0xff]  ;;  %v1276_v60 = vld [vmem:[%s2098_s3 + $0xa0] sm:$0xff]  ;;  %v1654_v30 = vld [vmem:[%s2099_s4 + $0x58] sm:$0xff]  }
  0x16   :  { %1574 = vmatprep.subr.bf16.mxu0 %v1573_v53  ;;  %1463 = vmatmul.mubr.msk.f32.vlgmr.msra.gmra.mrb[0].mxu1 %vm86_vm1, %v82_v59  ;;  %v1619_v52 = vpack.c.bf16 %v1272_v51, %v1271_v50  ;;  %v1650_v27 = vld [vmem:[%s2099_s4 + $0x48] sm:$0xff]   ;;  %v1655_v31 = vld [vmem:[%s2099_s4 + $0x18] sm:$0xff]   ;;  %v1661_v37 = vld [vmem:[%s2099_s4 + $0x30] sm:$0xff]  }
  0x17   :  { %1594 = vmatprep.subr.bf16.mxu1 %v1680_v3  ;;  %1473 = vmatprep.mubr.msk.f32.mxu1 %vm1682_vm0, %v1683_v11  ;;  %v1651_v28 = vld [vmem:[%s2099_s4 + $0x8] sm:$0xff]   ;;  %v1662_v38 = vld [vmem:[%s2099_s4 + $0x78] sm:$0xff]   ;;  %v1664_v51 = vld [vmem:[%s2099_s4 + $0xc0] sm:$0xff]  }
  0x18   :  { %1596 = vmatpush3.bf16.msra.mxu1 %v1595_v10  ;;  %v859_v47 = vld [vmem:[%s2100_s5 + $0x18] sm:$0xff] }
  0x19   :  { %1576 = vmatpush3.bf16.msra.mxu0 %v1575_v58  ;;  %1597 = vmatprep.subr.bf16.mxu1 %v1680_v3  ;;  %v1274_v58 = vld [vmem:[%s2098_s3 + $0x98] sm:$0xff] }
  0x1a   :  { %1578 = vmatprep.subr.bf16.mxu0 %v1577_v61  ;;  %v1622_v59 = vpack.c.bf16 %v1274_v58, %v1273_v57  ;;  %v1277_v61 = vld [vmem:[%s2098_s3 + $0xa8] sm:$0xff] }
  0x1b   :  { %v1625_v62 = vpack.c.bf16 %v1277_v61, %v1276_v60  ;;  %v1666_v57 = vld [vmem:[%s2099_s4 + $0xc8] sm:$0xff]   ;;  %v1669_v60 = vld [vmem:[%s2099_s4 + $0x90] sm:$0xff]   ;;  %v1670_v61 = vld [vmem:[%s2099_s4 + $0xd8] sm:$0xff]  }
  0x1c   :  { %1599 = vmatpush3.bf16.msra.mxu1 %v1598_v14  ;;  %v1667_v58 = vld [vmem:[%s2099_s4 + $0x88] sm:$0xff]  }
  0x1d   :  { %1580 = vmatpush3.bf16.msra.mxu0 %v1579_v2  ;;  %1600 = vmatprep.subr.bf16.mxu1 %v1680_v3 }
  0x1e   :  { %1582 = vmatprep.subr.bf16.mxu0 %v1581_v4  ;;  %v1278_v4 = vld [vmem:[%s2098_s3 + $0xb0] sm:$0xff] }
  0x1f   :  { %v1628_v6 = vpack.c.bf16 %v1279_v5, %v1278_v4  ;;  %v1676_v4 = vld [vmem:[%s2099_s4 + $0xf0] sm:$0xff]  }
  0x20   :  { %v1677_v5 = vld [vmem:[%s2099_s4 + $0xb0] sm:$0xff]  }
  0x21   :  { %1584 = vmatpush3.bf16.msra.mxu0 %v1583_v7  ;;  %v1281_v7 = vld [vmem:[%s2098_s3 + $0xc0] sm:$0xff] }
  0x22   :  { %1612 = vmatprep.subr.bf16.mxu0 %v1680_v3  ;;  %v1631_v9 = vpack.c.bf16 %v1282_v8, %v1281_v7  ;;  %v1679_v7 = vld [vmem:[%s2099_s4 + $0xb8] sm:$0xff]  }
  0x24   :  { %154 = vmatmul.mubr.f32.vlgmr.msra.gmra.mrb[0].mxu0 %v75_v46 }
  0x25   :  { %1506 = vmatprep.mubr.msk.f32.mxu0 %vm1682_vm0, %v1683_v11  ;;  %1614 = vmatpush3.bf16.msra.mxu0 %v1613_v42  ;;  %v944_v42 = vunpack.c.0.s8 %v943_v41 }
  0x26   :  { %1615 = vmatprep.subr.bf16.mxu0 %v1680_v3 }
  0x29   :  { %1617 = vmatpush3.bf16.msra.mxu0 %v1616_v49 }
  0x2a   :  { %1624 = vmatprep.subr.bf16.mxu0 %v1680_v3 }
  0xe9   :  { %v225_v15 = vpop.f32.mrb[0].mxu1 }
  0xea   :  { %v1464_v16 = vpop.f32.mrb[1].mxu1 }
  0xeb   :  { %v1284_v16 = vld [vmem:[%s2098_s3 + $0xd8] sm:$0xff] }
  0xf7   :  { %v1353_v17 = vpop.f32.mrb[0].mxu0 }
  0xf8   :  { %v1354_v18 = vpop.f32.mrb[1].mxu0 }
  0xf9   :  { %v1355_v19 = vadd.f32 %v1354_v18, %v1353_v17  ;;  %v1648_v18 = vld [vmem:[%s2099_s4 + $0x40] sm:$0xff]  }
  0xfb   :  { %v226_v20 = vadd.f32 %v1355_v19, %v225_v15  ;;  %v1283_v15 = vld [vmem:[%s2098_s3 + $0xd0] sm:$0xff]  ;;  %v856_v19 = vld [vmem:[%s2100_s5] sm:$0xff] }
  0xfc   :  { %v1634_v17 = vpack.c.bf16 %v1284_v16, %v1283_v15 }
  0xfd   :  { %v229_v24 = vmul.f32 0.2, %v226_v20 }
  0xff   :  { %v230_v26 = vmax.f32 %v226_v20, %v229_v24 }
 0x101   :  { %1474 = vmatmul.mubr.msk.f32.vlgmr.msra.gmra.mrb[2].mxu1 %vm235_vm2, %v230_v26 }
 0x102   :  { %1602 = vmatpush3.bf16.msra.mxu1 %v1601_v25  ;;  %1484 = vmatprep.mubr.msk.f32.mxu1 %vm1682_vm0, %v1683_v11  ;;  %v1649_v25 = vld [vmem:[%s2099_s4] sm:$0xff]  }
 0x103   :  { %1603 = vmatprep.subr.bf16.mxu1 %v1680_v3 }
 0x106   :  { %1605 = vmatpush3.bf16.msra.mxu1 %v1604_v29  ;;  %v1653_v29 = vld [vmem:[%s2099_s4 + $0x10] sm:$0xff]  }
 0x107   :  { %1606 = vmatprep.subr.bf16.mxu1 %v1680_v3 }
 0x1d4   :  { %v305_v32 = vpop.f32.mrb[2].mxu1 }
 0x1d5   :  { %v309_v33 = vmul.f32 0.2, %v305_v32  ;;  %v1475_v34 = vpop.f32.mrb[3].mxu1 }
 0x1d6   :  { %v1658_v34 = vld [vmem:[%s2099_s4 + $0x68] sm:$0xff]  }
 0x1d7   :  { %v310_v36 = vmax.f32 %v305_v32, %v309_v33  ;;  %v1656_v32 = vld [vmem:[%s2099_s4 + $0x60] sm:$0xff]  }
 0x1d8   :  { %v1657_v33 = vld [vmem:[%s2099_s4 + $0x20] sm:$0xff]  }
 0x1d9   :  { %1485 = vmatmul.mubr.msk.f32.vlgmr.msra.gmra.mrb[4].mxu1 %vm235_vm2, %v310_v36  ;;  %v1660_v36 = vld [vmem:[%s2099_s4 + $0x70] sm:$0xff]  }
 0x1da   :  { %1608 = vmatpush3.bf16.msra.mxu1 %v1607_v35  ;;  %1495 = vmatprep.mubr.msk.f32.mxu1 %vm1682_vm0, %v1683_v11  ;;  %v1659_v35 = vld [vmem:[%s2099_s4 + $0x28] sm:$0xff]  }
 0x1db   :  { %1609 = vmatprep.subr.bf16.mxu1 %v1680_v3 }
 0x1de   :  { %1611 = vmatpush3.bf16.msra.mxu1 %v1610_v39  ;;  %v1663_v39 = vld [vmem:[%s2099_s4 + $0x38] sm:$0xff]  }
 0x1df   :  { %1618 = vmatprep.subr.bf16.mxu1 %v1680_v3 }
 0x2ac   :  { %v385_v43 = vpop.f32.mrb[4].mxu1 }
 0x2ad   :  { %v389_v44 = vmul.f32 0.2, %v385_v43  ;;  %v1486_v45 = vpop.f32.mrb[5].mxu1 }
 0x2ae   :  { %v947_v45 = vsub.s32 %v944_v42, %v1764_v23 }
 0x2af   :  { %v390_v46 = vmax.f32 %v385_v43, %v389_v44  ;;  %v1287_v43 = vld.sshfl [vmem:[%s2101_s1] sm:$0x33 pattern:$0x75316420] }
 0x2b0   :  { %v941_v44 = vcombine.high %v1287_v43, %v1287_v43  ;;  %v948_v50 = vrot.slane %v1287_v43, %v947_v45 }
 0x2b1   :  { %1496 = vmatmul.mubr.msk.f32.vlgmr.msra.gmra.mrb[6].mxu1 %vm235_vm2, %v390_v46  ;;  %v858_v46 = vld [vmem:[%s2100_s5 + $0x10] sm:$0xff] }
 0x2b2   :  { %1517 = vmatprep.mubr.msk.f32.mxu1 %vm1682_vm0, %v1683_v11  ;;  %1620 = vmatpush3.bf16.msra.mxu1 %v1619_v52  ;;  %v1640_v48 = vpack.c.bf16 %v859_v47, %v858_v46  ;;  %v955_v49 = vrot.slane %v941_v44, %v947_v45  ;;  %v956_v8 = vcombine.high %v948_v50, %v948_v50 }
 0x2b3   :  { %1621 = vmatprep.subr.bf16.mxu1 %v1680_v3 }
 0x2b6   :  { %1623 = vmatpush3.bf16.msra.mxu1 %v1622_v59  ;;  %v1668_v59 = vld [vmem:[%s2099_s4 + $0xd0] sm:$0xff]  }
 0x2b7   :  { %1630 = vmatprep.subr.bf16.mxu1 %v1680_v3 }
 0x384   :  { %v465_v53 = vpop.f32.mrb[6].mxu1 }
 0x385   :  { %v469_v54 = vmul.f32 0.2, %v465_v53  ;;  %v1497_v55 = vpop.f32.mrb[7].mxu1 }
 0x386   :  { %v957_v55 = vcombine.high %v955_v49, %v955_v49 }
 0x387   :  { %v470_v56 = vmax.f32 %v465_v53, %v469_v54  ;;  %v1665_v54 = vld [vmem:[%s2099_s4 + $0x80] sm:$0xff]  }
 0x389   :  { %1507 = vmatmul.mubr.msk.f32.vlgmr.msra.gmra.mrb[2].mxu0 %vm235_vm2, %v470_v56 }
 0x38a   :  { %1528 = vmatprep.mubr.msk.f32.mxu0 %vm1682_vm0, %v1683_v11  ;;  %1626 = vmatpush3.bf16.msra.mxu0 %v1625_v62  ;;  %v1671_v62 = vld [vmem:[%s2099_s4 + $0x98] sm:$0xff]  }
 0x38b   :  { %1627 = vmatprep.subr.bf16.mxu0 %v1680_v3 }
 0x38e   :  { %1629 = vmatpush3.bf16.msra.mxu0 %v1628_v6  ;;  %v1678_v6 = vld [vmem:[%s2099_s4 + $0xf8] sm:$0xff]  }
 0x38f   :  { %1636 = vmatprep.subr.bf16.mxu0 %v1680_v3 }
 0x45c   :  { %v545_v63 = vpop.f32.mrb[2].mxu0 }
 0x45d   :  { %v549_v0 = vmul.f32 0.2, %v545_v63  ;;  %v1508_v1 = vpop.f32.mrb[3].mxu0 }
 0x45e   :  { %v1674_v1 = vld [vmem:[%s2099_s4 + $0xe8] sm:$0xff]  }
 0x45f   :  { %v550_v2 = vmax.f32 %v545_v63, %v549_v0  ;;  %v1672_v63 = vld [vmem:[%s2099_s4 + $0xe0] sm:$0xff]  }
 0x460   :  { %v1673_v0 = vld [vmem:[%s2099_s4 + $0xa0] sm:$0xff]  }
 0x461   :  { %1518 = vmatmul.mubr.msk.f32.vlgmr.msra.gmra.mrb[8].mxu1 %vm235_vm2, %v550_v2  ;;  %v1675_v2 = vld [vmem:[%s2099_s4 + $0xa8] sm:$0xff]  }
 0x462   :  { %1539 = vmatprep.mubr.msk.f32.mxu1 %vm1682_vm0, %v1683_v11  ;;  %1632 = vmatpush3.bf16.msra.mxu1 %v1631_v9 }
 0x463   :  { %1633 = vmatprep.subr.bf16.mxu1 %v1680_v3 }
 0x466   :  { %1635 = vmatpush3.bf16.msra.mxu1 %v1634_v17 }
 0x467   :  { %1404 = vmatprep.subr.bf16.mxu1 %v1648_v18 }
 0x534   :  { %v625_v10 = vpop.f32.mrb[8].mxu1 }
 0x535   :  { %v629_v12 = vmul.f32 0.2, %v625_v10  ;;  %v1519_v13 = vpop.f32.mrb[9].mxu1 }
 0x537   :  { %v630_v14 = vmax.f32 %v625_v10, %v629_v12 }
 0x539   :  { %1529 = vmatmul.mubr.msk.f32.vlgmr.msra.gmra.mrb[4].mxu0 %vm235_vm2, %v630_v14 }
 0x53a   :  { %1550 = vmatprep.mubr.msk.f32.mxu0 %vm1682_vm0, %v1683_v11  ;;  %v857_v11 = vld [vmem:[%s2100_s5 + $0x8] sm:$0xff] }
 0x53b   :  { %v1637_v20 = vpack.c.bf16 %v857_v11, %v856_v19 }
 0x53d   :  { %1638 = vmatpush3.bf16.msra.mxu0 %v1637_v20 }
 0x53e   :  { %1639 = vmatprep.subr.bf16.mxu0 %v1680_v3  ;;  %v1652_v3 = vld [vmem:[%s2099_s4 + $0x50] sm:$0xff]  }
 0x541   :  { %1641 = vmatpush3.bf16.msra.mxu0 %v1640_v48 }
 0x542   :  { %1426 = vmatprep.subr.bf16.mxu0 %v1664_v51 }
 0x60c   :  { %v705_v21 = vpop.f32.mrb[4].mxu0 }
 0x60d   :  { %v709_v22 = vmul.f32 0.2, %v705_v21  ;;  %v1530_v24 = vpop.f32.mrb[5].mxu0 }
 0x60f   :  { %v710_v26 = vmax.f32 %v705_v21, %v709_v22 }
 0x611   :  { %1540 = vmatmul.mubr.msk.f32.vlgmr.msra.gmra.mrb[10].mxu1 %vm235_vm2, %v710_v26 }
 0x612   :  { %1405 = vmatpush3.bf16.msra.mxu1 %v1649_v25  ;;  %1186 = vmatprep.mubr.bf16.mxu1 %v955_v49  ;;  %v1320_v25 = vld [vmem:[%s2102_s6] ss:$0 sm:$0xff] }
 0x613   :  { %1406 = vmatprep.subr.bf16.mxu1 %v1650_v27 }
 0x616   :  { %1407 = vmatpush3.bf16.msra.mxu1 %v1651_v28 }
 0x617   :  { %1408 = vmatprep.subr.bf16.mxu1 %v1652_v3 }
 0x61a   :  { %1409 = vmatpush3.bf16.msra.mxu1 %v1653_v29 }
 0x61b   :  { %1410 = vmatprep.subr.bf16.mxu1 %v1654_v30 }
 0x61e   :  { %1411 = vmatpush3.bf16.msra.mxu1 %v1655_v31 }
 0x61f   :  { %1412 = vmatprep.subr.bf16.mxu1 %v1656_v32 }
 0x622   :  { %1413 = vmatpush3.bf16.msra.mxu1 %v1657_v33 }
 0x623   :  { %1414 = vmatprep.subr.bf16.mxu1 %v1658_v34 }
 0x626   :  { %1415 = vmatpush3.bf16.msra.mxu1 %v1659_v35 }
 0x627   :  { %1416 = vmatprep.subr.bf16.mxu1 %v1660_v36 }
 0x62a   :  { %1417 = vmatpush3.bf16.msra.mxu1 %v1661_v37 }
 0x62b   :  { %1418 = vmatprep.subr.bf16.mxu1 %v1662_v38 }
 0x62e   :  { %1419 = vmatpush3.bf16.msra.mxu1 %v1663_v39 }
 0x631   :  { %1187 = vmatmul.mubr.bf16.vlgmr.msra.gmra.mrb[12].mxu1 %v948_v50 }
 0x6e4   :  { %v785_v23 = vpop.f32.mrb[10].mxu1 }
 0x6e5   :  { %v789_v52 = vmul.f32 0.2, %v785_v23  ;;  %v1541_v53 = vpop.f32.mrb[11].mxu1 }
 0x6e7   :  { %v790_v56 = vmax.f32 %v785_v23, %v789_v52 }
 0x6e9   :  { %1551 = vmatmul.mubr.msk.f32.vlgmr.msra.gmra.mrb[6].mxu0 %vm235_vm2, %v790_v56 }
 0x6ea   :  { %1427 = vmatpush3.bf16.msra.mxu0 %v1665_v54  ;;  %1226 = vmatprep.mubr.bf16.mxu0 %v957_v55 }
 0x6eb   :  { %1428 = vmatprep.subr.bf16.mxu0 %v1666_v57 }
 0x6ee   :  { %1429 = vmatpush3.bf16.msra.mxu0 %v1667_v58 }
 0x6ef   :  { %1430 = vmatprep.subr.bf16.mxu0 %v1668_v59 }
 0x6f2   :  { %1431 = vmatpush3.bf16.msra.mxu0 %v1669_v60 }
 0x6f3   :  { %1432 = vmatprep.subr.bf16.mxu0 %v1670_v61 }
 0x6f6   :  { %1433 = vmatpush3.bf16.msra.mxu0 %v1671_v62 }
 0x6f7   :  { %1434 = vmatprep.subr.bf16.mxu0 %v1672_v63 }
 0x6fa   :  { %1435 = vmatpush3.bf16.msra.mxu0 %v1673_v0 }
 0x6fb   :  { %1436 = vmatprep.subr.bf16.mxu0 %v1674_v1 }
 0x6fe   :  { %1437 = vmatpush3.bf16.msra.mxu0 %v1675_v2 }
 0x6ff   :  { %1438 = vmatprep.subr.bf16.mxu0 %v1676_v4 }
 0x702   :  { %1439 = vmatpush3.bf16.msra.mxu0 %v1677_v5 }
 0x703   :  { %1440 = vmatprep.subr.bf16.mxu0 %v1678_v6 }
 0x704   :  { %v1420_v9 = vpop.f32.mrb[12].mxu1 }
 0x705   :  { %v1421_v10 = vpop.f32.mrb[13].mxu1 }
 0x706   :  { %1441 = vmatpush3.bf16.msra.mxu0 %v1679_v7  ;;  %v1422_v12 = vadd.f32 %v1421_v10, %v1420_v9  ;;  %v1423_v13 = vpop.f32.mrb[14].mxu1 }
 0x707   :  { %v1424_v14 = vpop.f32.mrb[15].mxu1 }
 0x709   :  { %1227 = vmatmul.mubr.bf16.vlgmr.msra.gmra.mrb[8].mxu0 %v956_v8 }
 0x7bc   :  { %v929_v15 = vpop.f32.mrb[6].mxu0 }
 0x7bd   :  { %v1189_v16 = vadd.f32 %v1422_v12, %v929_v15  ;;  %v1552_v17 = vpop.f32.mrb[7].mxu0 }
 0x7dc   :  { %v1442_v18 = vpop.f32.mrb[8].mxu0 }
 0x7dd   :  { %v1443_v19 = vpop.f32.mrb[9].mxu0 }
 0x7de   :  { %v1444_v11 = vadd.f32 %v1443_v19, %v1442_v18  ;;  %v1445_v20 = vpop.f32.mrb[10].mxu0 }
 0x7df   :  { %v1446_v21 = vpop.f32.mrb[11].mxu0 }
 0x7e0   :  { %v1229_v22 = vadd.f32 %v1444_v11, %v1189_v16 }
 0x7e2   :  { %v1234_v24 = vmul.f32 0.2, %v1229_v22 }
 0x7e4   :  { %v1235_v26 = vmax.f32 %v1229_v22, %v1234_v24 }
 0x7e6   :  { %v1243_v27 = vmul.f32 %v1320_v25, %v1235_v26 }
 0x7e8   :  { %v1245_v28 = vsel %vm1244_vm3, %v1243_v27, 0.0 }
 0x7e9   :  { %1246 = vadd.xlane.f32.xlu0 %v1245_v28 }
 0x876   :  { %v1247_v3 = vpop.xlane.xlu0 %1246 }
 0x877   :  { %1249 = vst.msk [vmem:[%s2103_s7] sm:$0x3] %vm1248_vm4, %v1247_v3 }

</bundles_post_ra>
